<compile_context>
chip_gen: v7x
topology: tpu7x:2x2x1
jax: 0.10.0
libtpu: 0.0.40
codegen_flags: <defaults>
</compile_context>

<pallas_src>
import jax
import jax.numpy as jnp
from jax.experimental import pallas as pl
from jax.experimental.pallas import tpu as pltpu


LANE = 1024        # lane-dense width (multiple of 128) -> unmasked full-lane stores
ROW_ALIGN = 8      # f32 sublane alignment: minimum slab is (8, LANE) = 32 KiB


def _pick_tiling():
    """Per-generation (tile_rows, vmem_limit_bytes).

    A (tile_rows, LANE) f32 tile is tile_rows * 4096 bytes; the pipeline keeps
    ~4 such buffers live (double-buffered input + output).
    """
    kind = ""
    try:
        kind = jax.devices()[0].device_kind.lower()
    except Exception:
        pass
    if "v7" in kind:
        # 8 MiB tiles -> ~32 MiB of pipeline buffers, under v7x's 64 MiB physical VMEM.
        return 2048, 40 << 20
    if "v6" in kind:
        # 8 MiB tiles; 128 MiB physical but 32 MiB default scoped limit -> raise it.
        return 2048, 64 << 20
    # v5e (and unknown fallback): 2 MiB tiles fit the 16 MiB default scoped VMEM
    # with no override; per-step overhead is only ~7% at 0.8 TB/s, so bigger
    # tiles buy little there.
    return 512, None


def linear_regression_kernel(w_ref, b_ref, x_ref, o_ref):
    # w_ref, b_ref: SMEM scalars (shape (1,)); x_ref, o_ref: (tile_rows, LANE) VMEM tiles.
    # Pure streaming multiply-add on the VPU (HBM-bandwidth bound).
    o_ref[...] = x_ref[...] * w_ref[0] + b_ref[0]


def linear_regression(x, weight, bias):
    """x: [N, 1]; weight: [1, 1] (PyTorch [out, in] layout); bias: [1].

    Computes out = x @ W^T + b exactly as nn.Linear(1, 1). The reshape is
    layout plumbing only (a free bitcast on the aligned path); values are
    unchanged. Math is done in float32 (matching the f32 module); the output
    is cast back to x.dtype.
    """
    n = x.shape[0]
    out_dtype = x.dtype
    if n == 0:
        return jnp.zeros((0, 1), dtype=out_dtype)

    w_scalar = weight.reshape((1,)).astype(jnp.float32)
    b_scalar = bias.reshape((1,)).astype(jnp.float32)

    flat = x.reshape((-1,)).astype(jnp.float32)

    align = ROW_ALIGN * LANE                     # 8192 elements -> minimal (8, LANE) slab
    aligned = (n % align) == 0
    if aligned:
        padded = flat                            # zero-copy: reshape below is a bitcast
    else:
        n_pad = pl.cdiv(n, align) * align
        padded = jnp.pad(flat, (0, n_pad - n))   # ragged tail only; <= 8191 extra elems

    rows = padded.shape[0] // LANE               # multiple of 8 -> (8,128)-legal blocks
    x2d = padded.reshape((rows, LANE))

    tile_rows, vmem_limit = _pick_tiling()
    tile_rows = min(tile_rows, rows)             # tiny batches move only a 32 KiB slab
    grid = (pl.cdiv(rows, tile_rows),)           # Pallas masks the ragged final block

    out2d = pl.pallas_call(
        linear_regression_kernel,
        out_shape=jax.ShapeDtypeStruct((rows, LANE), jnp.float32),
        grid=grid,
        in_specs=[
            pl.BlockSpec(memory_space=pltpu.SMEM),                 # weight scalar
            pl.BlockSpec(memory_space=pltpu.SMEM),                 # bias scalar
            pl.BlockSpec((tile_rows, LANE), lambda i: (i, 0)),     # x tile (VMEM, pipelined)
        ],
        out_specs=pl.BlockSpec((tile_rows, LANE), lambda i: (i, 0)),
        compiler_params=pltpu.CompilerParams(
            dimension_semantics=("parallel",),     # shard tiles across TCs on v7x
            vmem_limit_bytes=vmem_limit,           # raised only where bigger tiles need it
        ),
    )(w_scalar, b_scalar, x2d)

    flat_out = out2d.reshape((-1,))
    if not aligned:
        flat_out = flat_out[:n]                   # only pays for the ragged case
    result = flat_out.reshape((n, 1))
    return result if out_dtype == jnp.float32 else result.astype(out_dtype)


if __name__ == "__main__":
    key = jax.random.PRNGKey(0)
    kx1, kx2, kw, kb = jax.random.split(key, 4)

    # Deterministic parameters mimicking PyTorch's default U(-1/sqrt(in), 1/sqrt(in))
    # with in_features = 1  =>  U(-1, 1).
    weight = jax.random.uniform(kw, (1, 1), minval=-1.0, maxval=1.0, dtype=jnp.float32)
    bias = jax.random.uniform(kb, (1,), minval=-1.0, maxval=1.0, dtype=jnp.float32)

    # 1) Aligned fast path: N a multiple of 8*LANE -> no pad, no slice, zero-copy reshape.
    N1 = ROW_ALIGN * LANE  # 8192 scalars -> a single (8, 1024) block
    x1 = jax.random.normal(kx1, (N1, 1), dtype=jnp.float32)
    out1 = jax.block_until_ready(linear_regression(x1, weight, bias))
    ref1 = x1 @ weight.T + bias
    assert out1.shape == (N1, 1)
    assert jnp.allclose(out1, ref1, atol=1e-6, rtol=1e-6)

    # 2) Ragged small batch (like the original demo): minimal pad/slice fallback.
    N2 = 8
    x2 = jax.random.normal(kx2, (N2, 1), dtype=jnp.float32)
    out2 = jax.block_until_ready(linear_regression(x2, weight, bias))
    ref2 = x2 @ weight.T + bias
    assert out2.shape == (N2, 1)
    assert jnp.allclose(out2, ref2, atol=1e-6, rtol=1e-6)

    print("KERNEL_OK")
</pallas_src>

<mosaic_0001>
module attributes {stable_mosaic.version = 11 : i64} {
  func.func @linear_regression_kernel(%arg0: i32, %arg1: memref<1xf32, #tpu.memory_space<smem>>, %arg2: memref<1xf32, #tpu.memory_space<smem>>, %arg3: memref<8x1024xf32, #tpu.memory_space<vmem>>, %arg4: memref<8x1024xf32, #tpu.memory_space<vmem>>) attributes {dimension_semantics = [#tpu.dimension_semantics<parallel>], iteration_bounds = array<i64: 1>, scalar_prefetch = 0 : i64, scratch_operands = 0 : i64, tpu.core_type = #tpu.core_type<tc>, window_params = [{transform_indices = @transform_0, window_bounds = array<i64: 1>}, {transform_indices = @transform_1, window_bounds = array<i64: 1>}, {transform_indices = @transform_2, window_bounds = array<i64: 8, 1024>}, {transform_indices = @transform_3, window_bounds = array<i64: 8, 1024>}]} {
    %c0 = arith.constant 0 : index
    %c0_0 = arith.constant 0 : index
    %0 = vector.load %arg3[%c0, %c0_0] : memref<8x1024xf32, #tpu.memory_space<vmem>>, vector<8x1024xf32>
    %c0_1 = arith.constant 0 : index
    %1 = memref.load %arg1[%c0_1] : memref<1xf32, #tpu.memory_space<smem>>
    %2 = vector.broadcast %1 : f32 to vector<8x1024xf32>
    %3 = arith.mulf %0, %2 : vector<8x1024xf32>
    %c0_2 = arith.constant 0 : index
    %4 = memref.load %arg2[%c0_2] : memref<1xf32, #tpu.memory_space<smem>>
    %5 = vector.broadcast %4 : f32 to vector<8x1024xf32>
    %6 = arith.addf %3, %5 : vector<8x1024xf32>
    %c0_3 = arith.constant 0 : index
    %c0_4 = arith.constant 0 : index
    %7 = vector.load %arg4[%c0_3, %c0_4] : memref<8x1024xf32, #tpu.memory_space<vmem>>, vector<8x1024xf32>
    tpu.vector_store %arg4[%c0_3, %c0_4], %6 {strides = array<i32>} : memref<8x1024xf32, #tpu.memory_space<vmem>>, vector<8x1024xf32>,
    return
  }
  func.func @transform_0(%arg0: i32) -> i32 {
    %c0_i32 = arith.constant 0 : i32
    %c0_i32_0 = arith.constant 0 : i32
    return %c0_i32 : i32
  }
  func.func @transform_1(%arg0: i32) -> i32 {
    %c0_i32 = arith.constant 0 : i32
    %c0_i32_0 = arith.constant 0 : i32
    return %c0_i32 : i32
  }
  func.func @transform_2(%arg0: i32) -> (i32, i32) {
    %c0_i32 = arith.constant 0 : i32
    %c0_i32_0 = arith.constant 0 : i32
    return %arg0, %c0_i32 : i32, i32
  }
  func.func @transform_3(%arg0: i32) -> (i32, i32) {
    %c0_i32 = arith.constant 0 : i32
    %c0_i32_0 = arith.constant 0 : i32
    return %arg0, %c0_i32 : i32, i32
  }
}

</mosaic_0001>

<bundles_post_ra>
// kernel: tpu_custom_call.1
= control target key start
LH: loop header
LB: loop body
LE: loop exit
PB: predicated region body
PF: predicated region fallthrough
CT: control target
= control target key end

     0   :  { %10 = vsyncpa [#allocation5], 0  ;;  %s182_s0 = inlined_call_operand.<no memory space> [shape: f32[1], index: 0, kind: input, shape index: {}]   ;;  %s183_s1 = inlined_call_operand.<no memory space> [shape: f32[1], index: 1, kind: input, shape index: {}]   ;;  %s184_s2 = inlined_call_operand.hbm [shape: f32[8,1024], index: 2, kind: input, shape index: {}]   ;;  %s185_s3 = inlined_call_operand.hbm [shape: f32[8,1024], index: 3, kind: output, shape index: {}]  }
   0x1   :  { %11 = vsyncpa [#allocation6], 0  ;;  %s130_s12 = smov [#allocation4]   ;;  %s82_s16 = scalar_lea.hbm %s184_s2, 1024 }
   0x2   :  { %s22_s13 = sshll.u32 %s130_s12, 4  ;;  %p83_p0 = scmp.ne.s32.totalorder %s184_s2, %s82_s16  ;;  %s23_s13 = int_to_ptr.vmem [resolvable:$true] %s22_s13 }
   0x3   :  { %p86_p1 = scmp.lt.u32.totalorder %s82_s16, %s184_s2 }
   0x5   :  { %p88_p2 = pnand %p86_p1, %p83_p0 }
   0x7   :  { %91 = shalt.err (!%p88_p2)
}
   0x8   :  { %s92_s21 = scalar_lea.vmem %s23_s13, 1024  ;;  %p97_p4 = scmp.lt.s32.totalorder %s23_s13, %s23_s13 }
   0x9   :  { %p93_p3 = scmp.ne.s32.totalorder %s23_s13, %s92_s21  ;;  %p98_p5 = scmp.lt.s32.totalorder %s92_s21, %s92_s21 }
   0xb   :  { %p99_p6 = por %p98_p5, %p97_p4 }
   0xd   :  { %p100_p7 = pnand %p99_p6, %p93_p3 }
   0xf   :  { %103 = shalt.err (!%p100_p7)
}
  0x10   :  { %25 = dma.hbm_to_vmem [thread:$0]  %s184_s2, 1024, %s23_s13, [#allocation5]  }
  0x11   :  { %126 = dma.done.wait [#allocation5], 1024  }
  0x12   :  { %127 = vsyncadd [#allocation5], 4294966272  ;;  %v38_v0 = vstv %s182_s0  ;;  %v29_v1 = vld [vmem:[#allocation4] sm:$0xff]  ;;  %v48_v2 = vstv %s183_s1  ;;  %v30_v3 = vld [vmem:[#allocation4 + $0x8] sm:$0xff]  ;;  %s131_s0 = smov [#allocation7]  }
  0x13   :  { %v31_v4 = vld [vmem:[#allocation4 + $0x10] sm:$0xff]  ;;  %v39_v5 = vmul.f32 %v38_v0, %v29_v1  ;;  %v40_v6 = vmul.f32 %v38_v0, %v30_v3  ;;  %v32_v8 = vld [vmem:[#allocation4 + $0x18] sm:$0xff]  ;;  %v33_v9 = vld [vmem:[#allocation4 + $0x20] sm:$0xff]  ;;  %s71_s2 = sshll.u32 %s131_s0, 4  ;;  %s72_s2 = int_to_ptr.vmem [resolvable:$true] %s71_s2 }
  0x14   :  { %v41_v7 = vmul.f32 %v38_v0, %v31_v4  ;;  %v34_v10 = vld [vmem:[#allocation4 + $0x28] sm:$0xff]  ;;  %v42_v11 = vmul.f32 %v38_v0, %v32_v8  ;;  %v43_v12 = vmul.f32 %v38_v0, %v33_v9  ;;  %v35_v14 = vld [vmem:[#allocation4 + $0x30] sm:$0xff]  ;;  %v36_v15 = vld [vmem:[#allocation4 + $0x38] sm:$0xff]  ;;  %s104_s1 = scalar_lea.vmem %s72_s2, 1024  ;;  %p109_p9 = scmp.lt.s32.totalorder %s72_s2, %s72_s2 }
  0x15   :  { %v44_v13 = vmul.f32 %v38_v0, %v34_v10  ;;  %v49_v16 = vadd.f32 %v48_v2, %v39_v5  ;;  %v50_v17 = vadd.f32 %v48_v2, %v40_v6  ;;  %v45_v19 = vmul.f32 %v38_v0, %v35_v14  ;;  %p105_p8 = scmp.ne.s32.totalorder %s72_s2, %s104_s1  ;;  %p110_p10 = scmp.lt.s32.totalorder %s104_s1, %s104_s1 }
  0x16   :  { %v51_v18 = vadd.f32 %v48_v2, %v41_v7  ;;  %v52_v20 = vadd.f32 %v48_v2, %v42_v11  ;;  %v53_v21 = vadd.f32 %v48_v2, %v43_v12  ;;  %v46_v23 = vmul.f32 %v38_v0, %v36_v15 }
  0x17   :  { %v54_v22 = vadd.f32 %v48_v2, %v44_v13  ;;  %57 = vst [vmem:[#allocation7] sm:$0xff] %v49_v16  ;;  %58 = vst [vmem:[#allocation7 + $0x8] sm:$0xff] %v50_v17  ;;  %v55_v24 = vadd.f32 %v48_v2, %v45_v19  ;;  %p111_p11 = por %p110_p10, %p109_p9 }
  0x18   :  { %59 = vst [vmem:[#allocation7 + $0x10] sm:$0xff] %v51_v18  ;;  %60 = vst [vmem:[#allocation7 + $0x18] sm:$0xff] %v52_v20  ;;  %v56_v25 = vadd.f32 %v48_v2, %v46_v23 }
  0x19   :  { %61 = vst [vmem:[#allocation7 + $0x20] sm:$0xff] %v53_v21  ;;  %62 = vst [vmem:[#allocation7 + $0x28] sm:$0xff] %v54_v22  ;;  %p112_p12 = pnand %p111_p11, %p105_p8 }
  0x1a   :  { %63 = vst [vmem:[#allocation7 + $0x30] sm:$0xff] %v55_v24  ;;  %64 = vst [vmem:[#allocation7 + $0x38] sm:$0xff] %v56_v25 }
  0x1b   :  { %115 = shalt.err (!%p112_p12)
}
  0x1c   :  { %s116_s30 = scalar_lea.hbm %s185_s3, 1024 }
  0x1d   :  { %p117_p13 = scmp.ne.s32.totalorder %s185_s3, %s116_s30  ;;  %p120_p0 = scmp.lt.u32.totalorder %s116_s30, %s185_s3 }
  0x1f   :  { %p122_p1 = pnand %p120_p0, %p117_p13 }
  0x21   :  { %125 = shalt.err (!%p122_p1)
}
  0x22   :  { %74 = dma.vmem_to_hbm [thread:$0]  %s72_s2, 1024, %s185_s3, [#allocation6]  }
  0x23   :  { %128 = dma.done.wait [#allocation6], 1024  }
  0x24   :  { %129 = vsyncadd [#allocation6], 4294966272 }
  0x25   :  { %78 = vsyncpa [#allocation5], 1 }
  0x26   :  { %79 = vsyncpa [#allocation6], 1 }

</bundles_post_ra>
